<compile_context>
chip_gen: v7x
topology: tpu7x:2x2x1
jax: 0.10.0
libtpu: 0.0.40
codegen_flags: <defaults>
</compile_context>

<pallas_src>
import jax
import jax.numpy as jnp
from jax.experimental import pallas as pl
from jax.experimental.pallas import tpu as pltpu


def _attention_kernel(x_ref, w_ref, b_ref, out_ref, wts_ref):
    # x_ref  : (TB, S, H)  VMEM  — TB batch rows per grid step (input dtype)
    # w_ref  : (1, H)      VMEM  — projection weight row (input dtype, shared)
    # b_ref  : (1,)        SMEM  — projection bias (f32 scalar)
    # out_ref: (TB, H)           — attention-pooled output (lane-dense)
    # wts_ref: (TB, S)           — softmax attention weights (lane-dense)
    w = w_ref[...]                                              # (1, H)

    # scores[b, s] = sum_h x[b, s, h] * w[h] + bias  -> (TB, S)
    # VPU multiply in input dtype + lane reduce with f32 accumulation
    # (no degenerate N=1 MXU matmul, no resident f32 copy of x).
    scores = jnp.sum(x_ref[...] * w[None, :, :], axis=-1,
                     dtype=jnp.float32) + b_ref[0]              # (TB, S)

    # Exact softmax over the sequence axis (last axis -> lane reduces).
    m = jnp.max(scores, axis=-1, keepdims=True)                 # (TB, 1)
    e = jnp.exp(scores - m)                                     # (TB, S)
    denom = jnp.sum(e, axis=-1, keepdims=True)                  # (TB, 1)
    p = e / denom                                               # exact normalization

    # out[b, h] = sum_s p[b, s] * x[b, s, h]  -> (TB, H)
    # VPU multiply in input dtype + sublane reduce, f32 accumulation.
    out = jnp.sum(p.astype(x_ref.dtype)[:, :, None] * x_ref[...],
                  axis=1, dtype=jnp.float32)                    # (TB, H)

    out_ref[...] = out.astype(out_ref.dtype)
    wts_ref[...] = p.astype(wts_ref.dtype)


def _round_up(x, m):
    return -(-x // m) * m


def _vmem_capacity_bytes():
    try:
        cap = int(pltpu.get_tpu_info().vmem_capacity_bytes)
        if cap > 0:
            return cap
    except Exception:
        pass
    return 64 * 1024 * 1024  # conservative per-TensorCore fallback (v7x)


def attention_forward(x, w, b, *, block_b=None):
    """x: (B, S, H); w: (H, 1); b: (1,).  Returns (out (B, H), weights (B, 1, S))."""
    B, S, H = x.shape
    dtype = x.dtype
    itemsize = jnp.dtype(dtype).itemsize

    # --- Per-generation VMEM budget (128 MiB v5e/v6e, 64 MiB v7x per TC). ---
    vmem_cap = _vmem_capacity_bytes()
    vmem_limit = int(min((vmem_cap * 3) // 4, 100 * 1024 * 1024))
    budget = int(vmem_limit * 0.9)                    # headroom for compiler scratch

    # --- Per-batch-row VMEM ledger (lane/sublane padding included). ---
    h_lanes = _round_up(H, 128)
    x_row = _round_up(S, 8) * h_lanes * itemsize      # one row of the (TB,S,H) block
    out_row = h_lanes * itemsize                      # one row of (TB,H)
    wts_row = _round_up(S, 128) * itemsize            # one row of (TB,S)
    f32_row = _round_up(S, 128) * 4                   # scores / exp rows (f32)
    temp_row = 2 * x_row + 4 * f32_row                # elementwise product temporaries
    per_row = 2 * x_row + 2 * out_row + 2 * wts_row + temp_row  # 2x = double-buffered

    if block_b is None:
        block_b = max(8, (budget // max(per_row, 1)) // 8 * 8)
    b8 = _round_up(B, 8)
    if b8 >= 16:
        # Keep >= 2 grid steps so v7x's two TensorCores both get work
        # (and pipelining has something to overlap); harmless on v5e/v6e.
        block_b = min(block_b, _round_up(b8 // 2, 8))
    block_b = int(max(8, min(block_b, b8)))           # multiple of 8

    # TODO(synk): for very large S*H (one batch row won't fit VMEM), add a
    # sequence-tiling grid axis ("arbitrary") with an online-softmax accumulator.

    w_row = w.reshape(1, H).astype(dtype)
    b_smem = b.reshape(1).astype(jnp.float32)

    grid = (pl.cdiv(B, block_b),)                     # ragged last block: no jnp.pad

    grid_spec = pltpu.PrefetchScalarGridSpec(
        num_scalar_prefetch=0,
        grid=grid,
        in_specs=[
            pl.BlockSpec((block_b, S, H), lambda i: (i, 0, 0)),      # x batch block
            pl.BlockSpec((1, H), lambda i: (0, 0)),                  # shared weight
            pl.BlockSpec(memory_space=pltpu.MemorySpace.SMEM),       # bias scalar
        ],
        out_specs=[
            pl.BlockSpec((block_b, H), lambda i: (i, 0)),            # pooled output
            pl.BlockSpec((block_b, S), lambda i: (i, 0)),            # weights slab
        ],
    )

    out_shapes = (
        jax.ShapeDtypeStruct((B, H), dtype),
        jax.ShapeDtypeStruct((B, S), dtype),
    )

    cost = pl.CostEstimate(
        flops=4 * B * S * H + 6 * B * S,
        transcendentals=B * S,
        bytes_accessed=(B * S * H + H) * itemsize + (B * H + B * S) * itemsize,
    )

    out, wts = pl.pallas_call(
        _attention_kernel,
        out_shape=out_shapes,
        grid_spec=grid_spec,
        compiler_params=pltpu.CompilerParams(
            dimension_semantics=("parallel",),
            vmem_limit_bytes=vmem_limit,
        ),
        cost_estimate=cost,
    )(x, w_row, b_smem)

    return out, wts.reshape(B, 1, S)


def _reference(x, w, b):
    scores = jnp.einsum("bsh,ho->bso", x, w) + b                      # (B, S, 1)
    wts = jax.nn.softmax(jnp.transpose(scores, (0, 2, 1)), axis=-1)   # (B, 1, S)
    out = jnp.matmul(wts, x)[:, 0, :]                                 # (B, H)
    return out, wts


if __name__ == "__main__":
    B, S, H = 2, 8, 32
    key = jax.random.PRNGKey(0)
    kx, kw, kb = jax.random.split(key, 3)

    x = jax.random.normal(kx, (B, S, H), dtype=jnp.float32)
    # Deterministic init mimicking torch.nn.Linear default: U(-1/sqrt(H), 1/sqrt(H))
    bound = 1.0 / (H ** 0.5)
    w = jax.random.uniform(kw, (H, 1), minval=-bound, maxval=bound, dtype=jnp.float32)
    b = jax.random.uniform(kb, (1,), minval=-bound, maxval=bound, dtype=jnp.float32)

    out, wts = attention_forward(x, w, b)
    out = jax.block_until_ready(out)
    wts = jax.block_until_ready(wts)

    ref_out, ref_wts = _reference(x, w, b)
    assert out.shape == (B, H)
    assert wts.shape == (B, 1, S)
    assert jnp.allclose(out, ref_out, atol=1e-4, rtol=1e-4)
    assert jnp.allclose(wts, ref_wts, atol=1e-4, rtol=1e-4)

    print("KERNEL_OK")
</pallas_src>

<mosaic_0001>
module attributes {stable_mosaic.version = 11 : i64} {
  func.func @_attention_kernel(%arg0: i32, %arg1: memref<8x8x32xf32, #tpu.memory_space<vmem>>, %arg2: memref<1x32xf32, #tpu.memory_space<vmem>>, %arg3: memref<1xf32, #tpu.memory_space<smem>>, %arg4: memref<8x32xf32, #tpu.memory_space<vmem>>, %arg5: memref<8x8xf32, #tpu.memory_space<vmem>>) attributes {dimension_semantics = [#tpu.dimension_semantics<parallel>], iteration_bounds = array<i64: 1>, scalar_prefetch = 0 : i64, scratch_operands = 0 : i64, tpu.core_type = #tpu.core_type<tc>, window_params = [{transform_indices = @transform_0, window_bounds = array<i64: 8, 8, 32>}, {pipeline_mode = #tpu.pipeline_mode<synchronous>, transform_indices = @transform_1, window_bounds = array<i64: 1, 32>}, {transform_indices = @transform_2, window_bounds = array<i64: 1>}, {transform_indices = @transform_3, window_bounds = array<i64: 8, 32>}, {transform_indices = @transform_4, window_bounds = array<i64: 8, 8>}]} {
    %c0 = arith.constant 0 : index
    %c0_0 = arith.constant 0 : index
    %0 = vector.load %arg2[%c0, %c0_0] : memref<1x32xf32, #tpu.memory_space<vmem>>, vector<1x32xf32>
    %c0_1 = arith.constant 0 : index
    %c0_2 = arith.constant 0 : index
    %c0_3 = arith.constant 0 : index
    %1 = vector.load %arg1[%c0_1, %c0_2, %c0_3] : memref<8x8x32xf32, #tpu.memory_space<vmem>>, vector<8x8x32xf32>
    %2 = vector.shape_cast %0 : vector<1x32xf32> to vector<1x1x32xf32>
    %3 = vector.broadcast %2 : vector<1x1x32xf32> to vector<8x8x32xf32>
    %4 = arith.mulf %1, %3 : vector<8x8x32xf32>
    %cst = arith.constant dense<0.000000e+00> : vector<8x8xf32>
    %5 = vector.multi_reduction <add>, %4, %cst [2] : vector<8x8x32xf32> to vector<8x8xf32>
    %c0_4 = arith.constant 0 : index
    %6 = memref.load %arg3[%c0_4] : memref<1xf32, #tpu.memory_space<smem>>
    %7 = vector.broadcast %6 : f32 to vector<8x8xf32>
    %8 = arith.addf %5, %7 : vector<8x8xf32>
    %cst_5 = arith.constant dense<0xFF800000> : vector<8xf32>
    %9 = vector.multi_reduction <maximumf>, %8, %cst_5 [1] : vector<8x8xf32> to vector<8xf32>
    %10 = vector.shape_cast %9 : vector<8xf32> to vector<8x1xf32>
    %11 = vector.broadcast %10 : vector<8x1xf32> to vector<8x8xf32>
    %12 = arith.subf %8, %11 : vector<8x8xf32>
    %13 = math.exp %12 : vector<8x8xf32>
    %cst_6 = arith.constant dense<0.000000e+00> : vector<8xf32>
    %14 = vector.multi_reduction <add>, %13, %cst_6 [1] : vector<8x8xf32> to vector<8xf32>
    %15 = vector.shape_cast %14 : vector<8xf32> to vector<8x1xf32>
    %16 = vector.broadcast %15 : vector<8x1xf32> to vector<8x8xf32>
    %17 = arith.divf %13, %16 : vector<8x8xf32>
    %18 = vector.shape_cast %17 : vector<8x8xf32> to vector<8x8x1xf32>
    %c0_7 = arith.constant 0 : index
    %c0_8 = arith.constant 0 : index
    %c0_9 = arith.constant 0 : index
    %19 = vector.load %arg1[%c0_7, %c0_8, %c0_9] : memref<8x8x32xf32, #tpu.memory_space<vmem>>, vector<8x8x32xf32>
    %20 = vector.broadcast %18 : vector<8x8x1xf32> to vector<8x8x32xf32>
    %21 = arith.mulf %20, %19 : vector<8x8x32xf32>
    %cst_10 = arith.constant dense<0.000000e+00> : vector<8x32xf32>
    %22 = vector.multi_reduction <add>, %21, %cst_10 [1] : vector<8x8x32xf32> to vector<8x32xf32>
    %c0_11 = arith.constant 0 : index
    %c0_12 = arith.constant 0 : index
    %23 = vector.load %arg4[%c0_11, %c0_12] : memref<8x32xf32, #tpu.memory_space<vmem>>, vector<8x32xf32>
    tpu.vector_store %arg4[%c0_11, %c0_12], %22 {strides = array<i32>} : memref<8x32xf32, #tpu.memory_space<vmem>>, vector<8x32xf32>,
    %c0_13 = arith.constant 0 : index
    %c0_14 = arith.constant 0 : index
    %24 = vector.load %arg5[%c0_13, %c0_14] : memref<8x8xf32, #tpu.memory_space<vmem>>, vector<8x8xf32>
    tpu.vector_store %arg5[%c0_13, %c0_14], %17 {strides = array<i32>} : memref<8x8xf32, #tpu.memory_space<vmem>>, vector<8x8xf32>,
    return
  }
  func.func @transform_0(%arg0: i32) -> (i32, i32, i32) {
    %c0_i32 = arith.constant 0 : i32
    %c0_i32_0 = arith.constant 0 : i32
    %c0_i32_1 = arith.constant 0 : i32
    return %arg0, %c0_i32, %c0_i32_0 : i32, i32, i32
  }
  func.func @transform_1(%arg0: i32) -> (i32, i32) {
    %c0_i32 = arith.constant 0 : i32
    %c0_i32_0 = arith.constant 0 : i32
    %c0_i32_1 = arith.constant 0 : i32
    return %c0_i32, %c0_i32_0 : i32, i32
  }
  func.func @transform_2(%arg0: i32) -> i32 {
    %c0_i32 = arith.constant 0 : i32
    %c0_i32_0 = arith.constant 0 : i32
    return %c0_i32 : i32
  }
  func.func @transform_3(%arg0: i32) -> (i32, i32) {
    %c0_i32 = arith.constant 0 : i32
    %c0_i32_0 = arith.constant 0 : i32
    return %arg0, %c0_i32 : i32, i32
  }
  func.func @transform_4(%arg0: i32) -> (i32, i32) {
    %c0_i32 = arith.constant 0 : i32
    %c0_i32_0 = arith.constant 0 : i32
    return %arg0, %c0_i32 : i32, i32
  }
}

</mosaic_0001>

<bundles_post_ra>
// kernel: tpu_custom_call.1
= control target key start
LH: loop header
LB: loop body
LE: loop exit
PB: predicated region body
PF: predicated region fallthrough
CT: control target
= control target key end

     0   :  { %11 = vsyncpa [#allocation4], 0  ;;  %s911_s0 = inlined_call_operand.hbm [shape: f32[2,8,32], index: 0, kind: input, shape index: {}]   ;;  %s912_s1 = inlined_call_operand.vmem [shape: f32[1,32], index: 1, kind: input, shape index: {}]   ;;  %s913_s2 = inlined_call_operand.<no memory space> [shape: f32[1], index: 2, kind: input, shape index: {}]   ;;  %s914_s3 = inlined_call_operand.hbm [shape: f32[2,32], index: 3, kind: output, shape index: {0}]   ;;  %s915_s4 = inlined_call_operand.hbm [shape: f32[2,8], index: 4, kind: output, shape index: {1}]  }
   0x1   :  { %12 = vsyncpa [#allocation5], 0 }
   0x2   :  { %13 = vsyncpa [#allocation8], 0 }
   0x3   :  { %18 = vsyncadd [#allocation4], 768  ;;  %s659_s15 = smov [#allocation3]   ;;  %s587_s19 = scalar_lea.hbm %s911_s0, 256 }
   0x4   :  { %s19_s16 = sshll.u32 %s659_s15, 4  ;;  %p588_p0 = scmp.ne.s32.totalorder %s911_s0, %s587_s19  ;;  %s20_s16 = int_to_ptr.vmem [resolvable:$true] %s19_s16 }
   0x5   :  { %p591_p1 = scmp.lt.u32.totalorder %s587_s19, %s911_s0 }
   0x7   :  { %p593_p2 = pnand %p591_p1, %p588_p0 }
   0x9   :  { %596 = shalt.err (!%p593_p2)
}
   0xa   :  { %s597_s24 = scalar_lea.vmem %s20_s16, 256  ;;  %s601_s25 = scalar_lea.vmem %s20_s16, 1024 }
   0xb   :  { %p598_p3 = scmp.ne.s32.totalorder %s20_s16, %s597_s24  ;;  %p602_p4 = scmp.lt.s32.totalorder %s20_s16, %s20_s16 }
   0xc   :  { %p603_p5 = scmp.lt.s32.totalorder %s601_s25, %s597_s24 }
   0xe   :  { %p604_p6 = por %p603_p5, %p602_p4 }
  0x10   :  { %p605_p7 = pnand %p604_p6, %p598_p3 }
  0x12   :  { %608 = shalt.err (!%p605_p7)
}
  0x13   :  { %s660_s26 = smov 128   ;;  %s661_s27 = smov 8  }
  0x14   :  { %25 = dma.hbm_to_vmem [thread:$0]  %s911_s0, 256, %s20_s16, [#allocation4], %s660_s26, %s660_s26, %s661_s27  }
  0x15   :  { %653 = dma.done.wait [#allocation4], 1024  }
  0x16   :  { %654 = vsyncadd [#allocation4], 4294966272  ;;  %v544_v0 = vld [vmem:[%s912_s1] ss:$0 sm:$0xff]  ;;  %vm56_vm0 = vcmask 261120   ;;  %v709_v2 = vld [vmem:[#allocation3 + $0x10] sm:$0xff]  ;;  %v99_v25 = vlaneseq  ;;  %v82_v28 = vstv %s913_s2 }
  0x17   :  { %v707_v1 = vld [vmem:[#allocation3] sm:$0xff]  ;;  %v50_v4 = vmul.f32 %v544_v0, %v709_v2  ;;  %v713_v5 = vld [vmem:[#allocation3 + $0x8] sm:$0xff]  ;;  %v715_v6 = vld [vmem:[#allocation3 + $0x18] sm:$0xff]  ;;  %vm133_vm1 = vcmask 1041409   ;;  %vm135_vm2 = vcmask 1042434   ;;  %vm137_vm3 = vcmask 1043459  }
  0x18   :  { %v48_v3 = vmul.f32 %v544_v0, %v707_v1  ;;  %v49_v7 = vmul.f32 %v544_v0, %v713_v5  ;;  %v51_v8 = vmul.f32 %v544_v0, %v715_v6  ;;  %v719_v9 = vld [vmem:[#allocation3 + $0x20] sm:$0xff]  ;;  %v721_v10 = vld [vmem:[#allocation3 + $0x28] sm:$0xff]  ;;  %v729_v17 = vld [vmem:[#allocation3 + $0x30] sm:$0xff]  ;;  %v100_v26 = vand.u32 127, %v99_v25 }
  0x19   :  { %v63_v12 = vsel %vm56_vm0, %v50_v4, 0.0  ;;  %v52_v15 = vmul.f32 %v544_v0, %v719_v9  ;;  %v53_v16 = vmul.f32 %v544_v0, %v721_v10  ;;  %v731_v18 = vld [vmem:[#allocation3 + $0x38] sm:$0xff]  ;;  %v54_v21 = vmul.f32 %v544_v0, %v729_v17 }
  0x1a   :  { %v57_v11 = vsel %vm56_vm0, %v48_v3, 0.0  ;;  %64 = vadd.xlane.f32.xlu1 %v63_v12  ;;  %v60_v13 = vsel %vm56_vm0, %v49_v7, 0.0  ;;  %v66_v14 = vsel %vm56_vm0, %v51_v8, 0.0  ;;  %v55_v22 = vmul.f32 %v544_v0, %v731_v18 }
  0x1b   :  { %58 = vadd.xlane.f32.xlu0 %v57_v11  ;;  %v69_v19 = vsel %vm56_vm0, %v52_v15, 0.0  ;;  %v72_v20 = vsel %vm56_vm0, %v53_v16, 0.0  ;;  %v75_v23 = vsel %vm56_vm0, %v54_v21, 0.0  ;;  %v739_v27 = vshrl.u32 %v99_v25, 7 }
  0x1c   :  { %v78_v24 = vsel %vm56_vm0, %v55_v22, 0.0  ;;  %vm139_vm4 = vcmask 1044484   ;;  %vm141_vm5 = vcmask 1045509   ;;  %vm143_vm6 = vcmask 1046534  }
  0x1d   :  { %v745_v31 = vsub.s32 %v100_v26, %v739_v27  ;;  %vm145_vm7 = vcmask 1047559   ;;  %vm148_vm8 = vcmask 64512   ;;  %v662_v62 = vmov 0  }
  0x1e   :  { %67 = vadd.xlane.f32.xlu1 %v66_v14  ;;  %554 = vset.pattern.permute.xlu0 %v662_v62  ;;  %v155_v63 = vsub.s32 0, %v739_v27  ;;  %v159_v0 = vsub.s32 1, %v739_v27  ;;  %v163_v3 = vsub.s32 2, %v739_v27  ;;  %v167_v4 = vsub.s32 3, %v739_v27 }
  0x1f   :  { %61 = vadd.xlane.f32.xlu0 %v60_v13  ;;  %553 = vset.pattern.permute.xlu1 %v662_v62  ;;  %v171_v13 = vsub.s32 4, %v739_v27  ;;  %v175_v22 = vsub.s32 5, %v739_v27  ;;  %v179_v26 = vsub.s32 6, %v739_v27 }
  0x22   :  { %73 = vadd.xlane.f32.xlu1 %v72_v20 }
  0x23   :  { %70 = vadd.xlane.f32.xlu0 %v69_v19 }
  0x26   :  { %79 = vadd.xlane.f32.xlu1 %v78_v24 }
  0x27   :  { %76 = vadd.xlane.f32.xlu0 %v75_v23 }
  0xa7   :  { %v65_v30 = vpop.xlane.xlu1 %64 }
  0xa8   :  { %v59_v29 = vpop.xlane.xlu0 %58  ;;  %v85_v33 = vadd.f32 %v82_v28, %v65_v30 }
  0xa9   :  { %v83_v32 = vadd.f32 %v82_v28, %v59_v29 }
  0xaa   :  { %v112_v41 = vrot.slane %v85_v33, %v745_v31 }
  0xab   :  { %v68_v35 = vpop.xlane.xlu1 %67  ;;  %v104_v38 = vrot.slane %v83_v32, %v745_v31 }
  0xac   :  { %v62_v34 = vpop.xlane.xlu0 %61  ;;  %v86_v37 = vadd.f32 %v82_v28, %v68_v35 }
  0xad   :  { %v84_v36 = vadd.f32 %v82_v28, %v62_v34 }
  0xae   :  { %v116_v40 = vrot.slane %v86_v37, %v745_v31 }
  0xaf   :  { %v108_v39 = vrot.slane %v84_v36, %v745_v31  ;;  %v74_v43 = vpop.xlane.xlu1 %73 }
  0xb0   :  { %v71_v42 = vpop.xlane.xlu0 %70  ;;  %v88_v46 = vadd.f32 %v82_v28, %v74_v43 }
  0xb1   :  { %v134_v44 = vsel %vm133_vm1, %v108_v39, %v104_v38  ;;  %v87_v45 = vadd.f32 %v82_v28, %v71_v42 }
  0xb2   :  { %v136_v47 = vsel %vm135_vm2, %v112_v41, %v134_v44  ;;  %v124_v50 = vrot.slane %v88_v46, %v745_v31 }
  0xb3   :  { %v138_v48 = vsel %vm137_vm3, %v116_v40, %v136_v47  ;;  %v120_v49 = vrot.slane %v87_v45, %v745_v31  ;;  %v80_v52 = vpop.xlane.xlu1 %79 }
  0xb4   :  { %v77_v51 = vpop.xlane.xlu0 %76  ;;  %v90_v55 = vadd.f32 %v82_v28, %v80_v52 }
  0xb5   :  { %v140_v53 = vsel %vm139_vm4, %v120_v49, %v138_v48  ;;  %v89_v54 = vadd.f32 %v82_v28, %v77_v51 }
  0xb6   :  { %v132_v57 = vrot.slane %v90_v55, %v745_v31  ;;  %v142_v58 = vsel %vm141_vm5, %v124_v50, %v140_v53 }
  0xb7   :  { %v128_v56 = vrot.slane %v89_v54, %v745_v31 }
  0xb9   :  { %v144_v59 = vsel %vm143_vm6, %v128_v56, %v142_v58 }
  0xba   :  { %v146_v60 = vsel %vm145_vm7, %v132_v57, %v144_v59 }
  0xbb   :  { %v149_v61 = vsel %vm148_vm8, %v146_v60, -inf }
  0xbc   :  { %150 = vmax.xlane.f32.xlu0 %v149_v61 }
 0x149   :  { %v151_v7 = vpop.xlane.xlu0 %150 }
 0x14a   :  { %v156_v8 = vrot.slane %v151_v7, %v155_v63  ;;  %v160_v11 = vrot.slane %v151_v7, %v159_v0  ;;  %v164_v12 = vrot.slane %v151_v7, %v163_v3  ;;  %v168_v14 = vrot.slane %v151_v7, %v167_v4 }
 0x14b   :  { %v172_v23 = vrot.slane %v151_v7, %v171_v13  ;;  %v176_v28 = vrot.slane %v151_v7, %v175_v22 }
 0x14c   :  { %v193_v15 = vsub.f32 %v83_v32, %v156_v8  ;;  %v194_v16 = vsub.f32 %v84_v36, %v160_v11  ;;  %v195_v19 = vsub.f32 %v85_v33, %v164_v12  ;;  %v196_v24 = vsub.f32 %v86_v37, %v168_v14 }
 0x14d   :  { %v197_v29 = vsub.f32 %v87_v45, %v172_v23  ;;  %v183_v32 = vsub.s32 7, %v739_v27  ;;  %v180_v33 = vrot.slane %v151_v7, %v179_v26  ;;  %v198_v34 = vsub.f32 %v88_v46, %v176_v28 }
 0x14e   :  { %v201_v20 = vmul.f32 1.442695, %v193_v15  ;;  %v203_v21 = vmul.f32 1.442695, %v194_v16  ;;  %v205_v25 = vmul.f32 1.442695, %v195_v19 }
 0x14f   :  { %v207_v30 = vmul.f32 1.442695, %v196_v24  ;;  %v209_v35 = vmul.f32 1.442695, %v197_v29  ;;  %v184_v38 = vrot.slane %v151_v7, %v183_v32  ;;  %v199_v39 = vsub.f32 %v89_v54, %v180_v33 }
 0x150   :  { %555 = vpow2.f32 %v201_v20  ;;  %v211_v40 = vmul.f32 1.442695, %v198_v34 }
 0x151   :  { %557 = vpow2.f32 %v203_v21  ;;  %v200_v42 = vsub.f32 %v90_v55, %v184_v38  ;;  %v213_v43 = vmul.f32 1.442695, %v199_v39 }
 0x152   :  { %559 = vpow2.f32 %v205_v25 }
 0x153   :  { %561 = vpow2.f32 %v207_v30  ;;  %v215_v45 = vmul.f32 1.442695, %v200_v42 }
 0x154   :  { %563 = vpow2.f32 %v209_v35 }
 0x155   :  { %565 = vpow2.f32 %v211_v40 }
 0x156   :  { %567 = vpow2.f32 %v213_v43 }
 0x157   :  { %569 = vpow2.f32 %v215_v45 }
 0x15a   :  { %v556_v36 = vpop.eup %555 }
 0x15b   :  { %v785_v37 = vpop.eup %557  ;;  %226 = vperm.xlu1 %553, %v556_v36  }
 0x15c   :  { %229 = vperm.xlu0 %554, %v785_v37   ;;  %v790_v41 = vpop.eup %559 }
 0x15d   :  { %v793_v44 = vpop.eup %561 }
 0x15e   :  { %v796_v46 = vpop.eup %563 }
 0x15f   :  { %232 = vperm.xlu1 %553, %v790_v41   ;;  %v799_v47 = vpop.eup %565 }
 0x160   :  { %v802_v48 = vpop.eup %567 }
 0x161   :  { %v805_v49 = vpop.eup %569 }
 0x163   :  { %235 = vperm.xlu1 %553, %v793_v44  }
 0x167   :  { %238 = vperm.xlu1 %553, %v796_v46  }
 0x16b   :  { %241 = vperm.xlu1 %553, %v799_v47  }
 0x16f   :  { %244 = vperm.xlu1 %553, %v802_v48  }
 0x173   :  { %247 = vperm.xlu1 %553, %v805_v49  }
 0x1da   :  { %v227_v50 = vpop.permute.xlu1 %226 }
 0x1db   :  { %v230_v54 = vpop.permute.xlu0 %229  ;;  %v252_v57 = vrot.slane %v227_v50, %v745_v31 }
 0x1dc   :  { %v256_v56 = vrot.slane %v230_v54, %v745_v31 }
 0x1de   :  { %v233_v51 = vpop.permute.xlu1 %232  ;;  %v281_v62 = vsel %vm133_vm1, %v256_v56, %v252_v57 }
 0x1df   :  { %v260_v58 = vrot.slane %v233_v51, %v745_v31 }
 0x1e1   :  { %v282_v8 = vsel %vm135_vm2, %v260_v58, %v281_v62 }
 0x1e2   :  { %v236_v52 = vpop.permute.xlu1 %235 }
 0x1e3   :  { %v264_v59 = vrot.slane %v236_v52, %v745_v31 }
 0x1e5   :  { %v283_v12 = vsel %vm137_vm3, %v264_v59, %v282_v8 }
 0x1e6   :  { %v239_v53 = vpop.permute.xlu1 %238 }
 0x1e7   :  { %v268_v60 = vrot.slane %v239_v53, %v745_v31 }
 0x1e9   :  { %v284_v14 = vsel %vm139_vm4, %v268_v60, %v283_v12 }
 0x1ea   :  { %v242_v55 = vpop.permute.xlu1 %241 }
 0x1eb   :  { %v272_v7 = vrot.slane %v242_v55, %v745_v31 }
 0x1ed   :  { %v285_v16 = vsel %vm141_vm5, %v272_v7, %v284_v14 }
 0x1ee   :  { %v245_v61 = vpop.permute.xlu1 %244 }
 0x1ef   :  { %v276_v11 = vrot.slane %v245_v61, %v745_v31 }
 0x1f1   :  { %v286_v20 = vsel %vm143_vm6, %v276_v11, %v285_v16 }
 0x1f2   :  { %v248_v15 = vpop.permute.xlu1 %247 }
 0x1f3   :  { %v280_v19 = vrot.slane %v248_v15, %v745_v31 }
 0x1f5   :  { %v287_v21 = vsel %vm145_vm7, %v280_v19, %v286_v20 }
 0x1f6   :  { %v289_v23 = vsel %vm148_vm8, %v287_v21, 0.0 }
 0x1f7   :  { %290 = vadd.xlane.f32.xlu1 %v289_v23 }
 0x284   :  { %v291_v24 = vpop.xlane.xlu1 %290 }
 0x285   :  { %v296_v25 = vrot.slane %v291_v24, %v155_v63  ;;  %v300_v28 = vrot.slane %v291_v24, %v159_v0  ;;  %v304_v29 = vrot.slane %v291_v24, %v163_v3  ;;  %v308_v30 = vrot.slane %v291_v24, %v167_v4 }
 0x286   :  { %v312_v34 = vrot.slane %v291_v24, %v171_v13  ;;  %v316_v63 = vrot.slane %v291_v24, %v175_v22  ;;  %v320_v3 = vrot.slane %v291_v24, %v179_v26  ;;  %v324_v13 = vrot.slane %v291_v24, %v183_v32 }
 0x287   :  { %571 = vrcp.f32 %v296_v25 }
 0x288   :  { %573 = vrcp.f32 %v300_v28 }
 0x289   :  { %575 = vrcp.f32 %v304_v29 }
 0x28a   :  { %577 = vrcp.f32 %v308_v30 }
 0x28b   :  { %579 = vrcp.f32 %v312_v34 }
 0x28c   :  { %581 = vrcp.f32 %v316_v63 }
 0x28d   :  { %583 = vrcp.f32 %v320_v3 }
 0x28e   :  { %585 = vrcp.f32 %v324_v13 }
 0x291   :  { %v572_v33 = vpop.eup %571 }
 0x292   :  { %v334_v35 = vmul.f32 %v572_v33, %v556_v36  ;;  %v574_v38 = vpop.eup %573 }
 0x293   :  { %v336_v0 = vmul.f32 %v574_v38, %v785_v37  ;;  %v576_v39 = vpop.eup %575 }
 0x294   :  { %351 = vperm.xlu0 %554, %v334_v35   ;;  %v338_v4 = vmul.f32 %v576_v39, %v790_v41  ;;  %v578_v40 = vpop.eup %577 }
 0x295   :  { %v340_v36 = vmul.f32 %v578_v40, %v793_v44  ;;  %v580_v42 = vpop.eup %579 }
 0x296   :  { %v342_v22 = vmul.f32 %v580_v42, %v796_v46  ;;  %v582_v37 = vpop.eup %581 }
 0x297   :  { %v344_v43 = vmul.f32 %v582_v37, %v799_v47  ;;  %v584_v26 = vpop.eup %583 }
 0x298   :  { %356 = vperm.xlu0 %554, %v336_v0   ;;  %v346_v41 = vmul.f32 %v584_v26, %v802_v48  ;;  %v586_v45 = vpop.eup %585 }
 0x299   :  { %v348_v27 = vmul.f32 %v586_v45, %v805_v49 }
 0x29c   :  { %361 = vperm.xlu0 %554, %v338_v4  }
 0x2a0   :  { %366 = vperm.xlu0 %554, %v340_v36  }
 0x2a4   :  { %371 = vperm.xlu0 %554, %v342_v22  }
 0x2a8   :  { %376 = vperm.xlu0 %554, %v344_v43  }
 0x2ac   :  { %381 = vperm.xlu0 %554, %v346_v41  }
 0x2b0   :  { %386 = vperm.xlu0 %554, %v348_v27  }
 0x313   :  { %v352_v32 = vpop.permute.xlu0 %351 }
 0x314   :  { %v389_v51 = vmul.f32 %v352_v32, %v707_v1  ;;  %v473_v14 = vrot.slane %v352_v32, %v745_v31 }
 0x316   :  { %v397_v53 = vsel %vm56_vm0, %v389_v51, 0.0 }
 0x317   :  { %v357_v44 = vpop.permute.xlu0 %356  ;;  %v398_v56 = vrot.slane %v397_v53, 4 }
 0x318   :  { %v390_v50 = vmul.f32 %v357_v44, %v713_v5  ;;  %v477_v12 = vrot.slane %v357_v44, %v745_v31 }
 0x31a   :  { %v404_v47 = vsel %vm56_vm0, %v390_v50, 0.0  ;;  %v502_v30 = vsel %vm133_vm1, %v477_v12, %v473_v14 }
 0x31b   :  { %v362_v46 = vpop.permute.xlu0 %361  ;;  %v405_v49 = vrot.slane %v404_v47, 4 }
 0x31c   :  { %v391_v52 = vmul.f32 %v362_v46, %v709_v2  ;;  %v399_v2 = vadd.f32 %v398_v56, %v397_v53  ;;  %v481_v16 = vrot.slane %v362_v46, %v745_v31 }
 0x31d   :  { %v406_v60 = vadd.f32 %v405_v49, %v404_v47 }
 0x31e   :  { %v411_v48 = vsel %vm56_vm0, %v391_v52, 0.0  ;;  %v400_v20 = vrot.slane %v399_v2, 2  ;;  %v503_v38 = vsel %vm135_vm2, %v481_v16, %v502_v30 }
 0x31f   :  { %v367_v54 = vpop.permute.xlu0 %366  ;;  %v412_v57 = vrot.slane %v411_v48, 4  ;;  %v407_v15 = vrot.slane %v406_v60, 2 }
 0x320   :  { %v392_v55 = vmul.f32 %v367_v54, %v715_v6  ;;  %v485_v21 = vrot.slane %v367_v54, %v745_v31  ;;  %v401_v39 = vadd.f32 %v400_v20, %v399_v2 }
 0x321   :  { %v413_v61 = vadd.f32 %v412_v57, %v411_v48  ;;  %v408_v35 = vadd.f32 %v407_v15, %v406_v60 }
 0x322   :  { %v418_v58 = vsel %vm56_vm0, %v392_v55, 0.0  ;;  %v504_v4 = vsel %vm137_vm3, %v485_v21, %v503_v38  ;;  %v402_v52 = vrot.slane %v401_v39, 1 }
 0x323   :  { %v419_v5 = vrot.slane %v418_v58, 4  ;;  %v372_v59 = vpop.permute.xlu0 %371  ;;  %v409_v45 = vrot.slane %v408_v35, 1 }
 0x324   :  { %v393_v1 = vmul.f32 %v372_v59, %v719_v9  ;;  %v414_v9 = vrot.slane %v413_v61, 2  ;;  %v489_v25 = vrot.slane %v372_v59, %v745_v31  ;;  %v403_v57 = vadd.f32 %v402_v52, %v401_v39 }
 0x325   :  { %v420_v7 = vadd.f32 %v419_v5, %v418_v58 }
 0x326   :  { %v425_v62 = vsel %vm56_vm0, %v393_v1, 0.0  ;;  %v415_v3 = vadd.f32 %v414_v9, %v413_v61  ;;  %v505_v36 = vsel %vm139_vm4, %v489_v25, %v504_v4 }
 0x327   :  { %v426_v8 = vrot.slane %v425_v62, 4  ;;  %v377_v11 = vpop.permute.xlu0 %376  ;;  %v421_v24 = vrot.slane %v420_v7, 2 }
 0x328   :  { %v394_v6 = vmul.f32 %v377_v11, %v721_v10  ;;  %v493_v33 = vrot.slane %v377_v11, %v745_v31  ;;  %v416_v50 = vrot.slane %v415_v3, 1 }
 0x329   :  { %v427_v19 = vadd.f32 %v426_v8, %v425_v62  ;;  %v422_v13 = vadd.f32 %v421_v24, %v420_v7 }
 0x32a   :  { %v432_v23 = vsel %vm56_vm0, %v394_v6, 0.0  ;;  %v417_v56 = vadd.f32 %v416_v50, %v415_v3 }
 0x32b   :  { %v433_v28 = vrot.slane %v432_v23, 4  ;;  %v382_v29 = vpop.permute.xlu0 %381  ;;  %v428_v10 = vrot.slane %v427_v19, 2  ;;  %v423_v47 = vrot.slane %v422_v13, 1 }
 0x32c   :  { %v395_v34 = vmul.f32 %v382_v29, %v729_v17  ;;  %v497_v0 = vrot.slane %v382_v29, %v745_v31  ;;  %v506_v17 = vsel %vm141_vm5, %v493_v33, %v505_v36 }
 0x32d   :  { %v434_v63 = vadd.f32 %v433_v28, %v432_v23  ;;  %v429_v43 = vadd.f32 %v428_v10, %v427_v19  ;;  %v424_v58 = vadd.f32 %v423_v47, %v422_v13 }
 0x32e   :  { %v439_v40 = vsel %vm56_vm0, %v395_v34, 0.0  ;;  %v507_v44 = vsel %vm143_vm6, %v497_v0, %v506_v17 }
 0x32f   :  { %v435_v42 = vrot.slane %v434_v63, 2  ;;  %v440_v22 = vrot.slane %v439_v40, 4  ;;  %v387_v37 = vpop.permute.xlu0 %386  ;;  %v430_v54 = vrot.slane %v429_v43, 1 }
 0x330   :  { %v396_v26 = vmul.f32 %v387_v37, %v731_v18  ;;  %v501_v41 = vrot.slane %v387_v37, %v745_v31  ;;  %v410_v18 = vadd.f32 %v409_v45, %v408_v35 }
 0x331   :  { %v436_v27 = vadd.f32 %v435_v42, %v434_v63  ;;  %v441_v32 = vadd.f32 %v440_v22, %v439_v40  ;;  %v431_v1 = vadd.f32 %v430_v54, %v429_v43 }
 0x332   :  { %v446_v51 = vsel %vm56_vm0, %v396_v26, 0.0  ;;  %v508_v46 = vsel %vm145_vm7, %v501_v41, %v507_v44  ;;  %v461_v60 = vsel %vm133_vm1, %v410_v18, %v403_v57 }
 0x333   :  { %v442_v53 = vrot.slane %v441_v32, 2  ;;  %v447_v48 = vrot.slane %v446_v51, 4  ;;  %510 = vst.msk [vmem:[#allocation7] sm:$0xff] %vm148_vm8, %v508_v46  ;;  %v437_v55 = vrot.slane %v436_v27, 1  ;;  %v462_v62 = vsel %vm135_vm2, %v417_v56, %v461_v60 }
 0x334   :  { %v463_v8 = vsel %vm137_vm3, %v424_v58, %v462_v62 }
 0x335   :  { %v443_v31 = vadd.f32 %v442_v53, %v441_v32  ;;  %v448_v49 = vadd.f32 %v447_v48, %v446_v51  ;;  %v438_v2 = vadd.f32 %v437_v55, %v436_v27  ;;  %v464_v12 = vsel %vm139_vm4, %v431_v1, %v463_v8 }
 0x337   :  { %v444_v5 = vrot.slane %v443_v31, 1  ;;  %v449_v59 = vrot.slane %v448_v49, 2  ;;  %v465_v6 = vsel %vm141_vm5, %v438_v2, %v464_v12 }
 0x339   :  { %v450_v61 = vadd.f32 %v449_v59, %v448_v49  ;;  %v445_v7 = vadd.f32 %v444_v5, %v443_v31 }
 0x33b   :  { %v451_v11 = vrot.slane %v450_v61, 1  ;;  %v466_v15 = vsel %vm143_vm6, %v445_v7, %v465_v6 }
 0x33d   :  { %v452_v14 = vadd.f32 %v451_v11, %v450_v61 }
 0x33f   :  { %v467_v16 = vsel %vm145_vm7, %v452_v14, %v466_v15 }
 0x340   :  { %469 = vst.msk [vmem:[#allocation6] sm:$0xff] %vm56_vm0, %v467_v16 }
 0x341   :  { %515 = vsyncadd [#allocation5], 96  ;;  %s663_s2 = smov [#allocation6]  }
 0x342   :  { %s516_s6 = sshll.u32 %s663_s2, 4  ;;  %s517_s6 = int_to_ptr.vmem [resolvable:$true] %s516_s6 }
 0x343   :  { %s609_s7 = scalar_lea.vmem %s517_s6, 32  ;;  %s613_s8 = scalar_lea.vmem %s517_s6, 128 }
 0x344   :  { %p610_p8 = scmp.ne.s32.totalorder %s517_s6, %s609_s7  ;;  %p614_p9 = scmp.lt.s32.totalorder %s517_s6, %s517_s6 }
 0x345   :  { %p615_p10 = scmp.lt.s32.totalorder %s613_s8, %s609_s7 }
 0x347   :  { %p616_p11 = por %p615_p10, %p614_p9 }
 0x349   :  { %p617_p12 = pnand %p616_p11, %p610_p8 }
 0x34b   :  { %620 = shalt.err (!%p617_p12)
}
 0x34c   :  { %s621_s11 = scalar_lea.hbm %s914_s3, 32 }
 0x34d   :  { %p622_p13 = scmp.ne.s32.totalorder %s914_s3, %s621_s11  ;;  %p625_p0 = scmp.lt.u32.totalorder %s621_s11, %s914_s3 }
 0x34f   :  { %p627_p1 = pnand %p625_p0, %p622_p13 }
 0x351   :  { %630 = shalt.err (!%p627_p1)
}
 0x352   :  { %s664_s16 = smov 32   ;;  %s665_s17 = smov 2  }
 0x353   :  { %522 = dma.vmem_to_hbm [thread:$0]  %s517_s6, 32, %s914_s3, [#allocation5], %s664_s16, %s664_s16, %s665_s17  }
 0x354   :  { %527 = vsyncadd [#allocation8], 96  ;;  %s666_s20 = smov [#allocation7]  }
 0x355   :  { %s528_s21 = sshll.u32 %s666_s20, 4  ;;  %s529_s21 = int_to_ptr.vmem [resolvable:$true] %s528_s21 }
 0x356   :  { %s631_s22 = scalar_lea.vmem %s529_s21, 32  ;;  %s635_s23 = scalar_lea.vmem %s529_s21, 128 }
 0x357   :  { %p632_p2 = scmp.ne.s32.totalorder %s529_s21, %s631_s22  ;;  %p636_p3 = scmp.lt.s32.totalorder %s529_s21, %s529_s21 }
 0x358   :  { %p637_p4 = scmp.lt.s32.totalorder %s635_s23, %s631_s22 }
 0x35a   :  { %p638_p5 = por %p637_p4, %p636_p3 }
 0x35c   :  { %p639_p6 = pnand %p638_p5, %p632_p2 }
 0x35e   :  { %642 = shalt.err (!%p639_p6)
}
 0x35f   :  { %s643_s26 = scalar_lea.hbm %s915_s4, 32 }
 0x360   :  { %p644_p7 = scmp.ne.s32.totalorder %s915_s4, %s643_s26  ;;  %p647_p8 = scmp.lt.u32.totalorder %s643_s26, %s915_s4 }
 0x362   :  { %p649_p9 = pnand %p647_p8, %p644_p7 }
 0x364   :  { %652 = shalt.err (!%p649_p9)
}
 0x365   :  { %534 = dma.vmem_to_hbm [thread:$0]  %s529_s21, 32, %s915_s4, [#allocation8], %s664_s16, %s664_s16, %s665_s17  }
 0x366   :  { %655 = dma.done.wait [#allocation5], 128  }
 0x367   :  { %656 = vsyncadd [#allocation5], 4294967168 }
 0x368   :  { %657 = dma.done.wait [#allocation8], 128  }
 0x369   :  { %658 = vsyncadd [#allocation8], 4294967168 }
 0x36a   :  { %541 = vsyncpa [#allocation4], 1 }
 0x36b   :  { %542 = vsyncpa [#allocation5], 1 }
 0x36c   :  { %543 = vsyncpa [#allocation8], 1 }

</bundles_post_ra>
